<compile_context>
chip_gen: v6e
topology: v6e:2x2x1
jax: 0.10.0
libtpu: 0.0.40
codegen_flags: <defaults>
</compile_context>

<pallas_src>
import functools
import math

import jax
import jax.numpy as jnp
from jax.experimental import pallas as pl
from jax.experimental.pallas import tpu as pltpu

_LANE = 128      # last-dim (lane) alignment for weights / activations / output
_SUBLANE = 8     # second-to-last (sublane) alignment for f32


def _round_up(x: int, m: int) -> int:
    return ((x + m - 1) // m) * m


# --------------------------------------------------------------------------
# Kernel
# --------------------------------------------------------------------------
def _fused_mlp_kernel(*refs, num_layers: int, compute_dtype, precision):
    """refs = (x_ref, w1_ref, b1_ref, ..., wL_ref, bL_ref, o_ref).

    Hidden layers: y = tanh(x @ W + b); last layer: y = x @ W + b.
    Matmuls run on the MXU in `compute_dtype` with f32 accumulation; bias add
    and tanh stay in f32 (VALU/EUP — required on v5e, free elsewhere).  On the
    bf16 path the activation is cast back to bf16 once per layer so the live
    working set (and the next matmul's input) stays half-width.
    """
    x_ref = refs[0]
    o_ref = refs[-1]
    wb_refs = refs[1:-1]

    h = x_ref[...].astype(compute_dtype)           # cast once, before the loop
    for layer in range(num_layers):
        w_ref = wb_refs[2 * layer]
        b_ref = wb_refs[2 * layer + 1]
        acc = jnp.dot(h, w_ref[...],
                      preferred_element_type=jnp.float32,
                      precision=precision)
        acc = acc + b_ref[...].astype(jnp.float32)  # (1, Dout) broadcasts over rows
        if layer < num_layers - 1:
            h = jnp.tanh(acc).astype(compute_dtype)
        else:
            h = acc
    o_ref[...] = h.astype(o_ref.dtype)


# --------------------------------------------------------------------------
# Wrapper helpers
# --------------------------------------------------------------------------
def _resident_spec(shape):
    """Full-extent spec with constant index_map -> fetched once, resident.

    Single-buffer it (default is double buffering) to halve its VMEM cost.
    """
    if hasattr(pl, "Buffered"):
        try:
            return pl.BlockSpec(shape, lambda i: (0, 0),
                                pipeline_mode=pl.Buffered(1))
        except TypeError:  # pipeline_mode not supported by this BlockSpec API
            pass
    return pl.BlockSpec(shape, lambda i: (0, 0))


def _choose_batch_tile(B: int, block_batch: int) -> int:
    tm = min(block_batch, _round_up(B, _SUBLANE))
    # v7x has 2 TensorCores: once the batch is big enough that splitting pays
    # for the extra grid step, make sure the parallel grid has >= 2 tiles.
    if B >= 256 and pl.cdiv(B, tm) < 2:
        tm = _round_up(pl.cdiv(B, 2), _SUBLANE)
    return max(_SUBLANE, _round_up(tm, _SUBLANE))


def _vmem_limit_bytes(resident_bytes: int, streamed_tile_bytes: int,
                      act_bytes: int) -> int:
    try:
        cap = int(pltpu.get_tpu_info().vmem_capacity_bytes)
    except Exception:  # no info available -> assume smallest (v7x per-TC 64 MiB)
        cap = 64 * 1024 * 1024
    need = (resident_bytes                # single-buffered resident weights/biases
            + 2 * streamed_tile_bytes     # double-buffered x / out tiles
            + act_bytes)                  # live f32 accumulator + activations
    # ~1.5x headroom for Mosaic internal scratch; never above ~85% of physical.
    return int(min(max(need * 3 // 2, 16 << 20), cap * 85 // 100))


def prepare_mlp_params(params, compute_dtype=jnp.float32):
    """Pad / cast weights & biases ONCE (reused across forward calls).

    params: [(w_t[Din,Dout], b[1,Dout] or None), ...]  (w_t already [in, out]).
    Output feature dims are zero-padded to multiples of 128 (lane-dense); the
    first layer keeps the TRUE input dim so x is streamed unpadded.  Zero
    padding keeps padded lanes exactly 0 through every layer (tanh(0)=0), so
    they never leak into real outputs.
    """
    dims = [params[0][0].shape[0]] + [w.shape[1] for w, _ in params]
    padded = [dims[0]] + [_round_up(d, _LANE) for d in dims[1:]]
    prepared = []
    for li, (w, b) in enumerate(params):
        fi, fo = w.shape
        pi, po = padded[li], padded[li + 1]
        w_p = jnp.zeros((pi, po), compute_dtype).at[:fi, :fo].set(
            w.astype(compute_dtype))
        b_arr = b if b is not None else jnp.zeros((1, fo), jnp.float32)
        b_p = jnp.zeros((1, po), jnp.float32).at[:, :fo].set(
            b_arr.reshape(1, -1).astype(jnp.float32))
        prepared.append((w_p, b_p))
    return prepared, tuple(dims), tuple(padded)


def _mlp_pallas(prepared, x, *, dims, padded, block_batch, compute_dtype):
    B, Din = x.shape
    assert Din == dims[0], f"expected input dim {dims[0]}, got {Din}"
    num_layers = len(prepared)
    Dout, Dout_p = dims[-1], padded[-1]

    tm = _choose_batch_tile(B, block_batch)
    grid = (pl.cdiv(B, tm),)   # ragged last block is edge-masked by Pallas

    in_specs = [pl.BlockSpec((tm, Din), lambda i: (i, 0))]
    operands = [x]
    for w_p, b_p in prepared:
        in_specs.append(_resident_spec(w_p.shape))
        in_specs.append(_resident_spec(b_p.shape))
        operands.append(w_p)
        operands.append(b_p)
    out_spec = pl.BlockSpec((tm, Dout_p), lambda i: (i, 0))

    # VMEM budget (no double counting; dtype-aware).
    c_item = jnp.dtype(compute_dtype).itemsize
    x_item = jnp.dtype(x.dtype).itemsize
    resident = (sum(w.size for w, _ in prepared) * c_item
                + sum(b.size for _, b in prepared) * 4)
    streamed_tile = tm * Din * x_item + tm * Dout_p * x_item
    act = 3 * tm * max(padded[1:]) * 4
    vmem_limit = _vmem_limit_bytes(resident, streamed_tile, act)
    # TODO(synk): if hidden dims grow beyond what fits resident in
    # get_tpu_info().vmem_capacity_bytes (~1.5-2k wide on v7x), add a K/N
    # reduction grid axis (or emit_pipeline weight streaming) with a VMEM f32
    # accumulator instead of keeping full weights resident.

    precision = (jax.lax.Precision.HIGHEST if compute_dtype == jnp.float32
                 else jax.lax.Precision.DEFAULT)
    kernel = functools.partial(_fused_mlp_kernel, num_layers=num_layers,
                               compute_dtype=compute_dtype, precision=precision)
    out_p = pl.pallas_call(
        kernel,
        out_shape=jax.ShapeDtypeStruct((B, Dout_p), x.dtype),
        grid=grid,
        in_specs=in_specs,
        out_specs=out_spec,
        compiler_params=pltpu.CompilerParams(
            dimension_semantics=("parallel",),
            vmem_limit_bytes=int(vmem_limit),
        ),
    )(*operands)
    return out_p[:, :Dout]


def make_mlp_forward(params, *, compute_dtype=jnp.float32, block_batch=512):
    """Pad/cast params once and return a jitted forward(x) closure."""
    prepared, dims, padded = prepare_mlp_params(params, compute_dtype)

    def forward(x):
        return _mlp_pallas(prepared, x, dims=dims, padded=padded,
                           block_batch=block_batch,
                           compute_dtype=compute_dtype)

    return jax.jit(forward)


# --------------------------------------------------------------------------
# Reference / init (mimics nn.Linear default init)
# --------------------------------------------------------------------------
def init_mlp_params(key, input_dim, output_dim, hidden_dims, use_biases=None):
    sizes = [input_dim] + list(hidden_dims)
    use_biases = [True] * len(sizes) if use_biases is None else list(use_biases)
    params = []
    dims = list(zip(sizes[:-1], sizes[1:])) + [(sizes[-1], output_dim)]
    for (fan_in, fan_out), has_bias in zip(dims, use_biases[: len(dims)]):
        key, wk, bk = jax.random.split(key, 3)
        bound = 1.0 / math.sqrt(fan_in)
        # PyTorch weight is [out, in]; store transposed [in, out] for the kernel.
        w_t = jax.random.uniform(wk, (fan_in, fan_out), jnp.float32, -bound, bound)
        if has_bias:
            b = jax.random.uniform(bk, (1, fan_out), jnp.float32, -bound, bound)
        else:
            b = jnp.zeros((1, fan_out), jnp.float32)
        params.append((w_t, b))
    return params


def mlp_reference(params, x):
    *hidden, last = params
    for w_t, b in hidden:
        x = jnp.tanh(x @ w_t + b)
    w_t, b = last
    return x @ w_t + b


if __name__ == "__main__":
    # Config consistent with the module: MLP(input_dim=4, output_dim=8,
    # hidden_dims=[32, 32], activation='Tanh', last_activation='Identity')
    batch, input_dim, output_dim = 2, 4, 8
    hidden_dims = [32, 32]

    key = jax.random.PRNGKey(0)
    pkey, xkey = jax.random.split(key)
    params = init_mlp_params(pkey, input_dim, output_dim, hidden_dims)
    x = jax.random.normal(xkey, (batch, input_dim), jnp.float32)

    ref = mlp_reference(params, x)

    # f32 path (precision=HIGHEST -> exact match vs reference).
    fwd_f32 = make_mlp_forward(params, compute_dtype=jnp.float32)
    out = jax.block_until_ready(fwd_f32(x))
    assert out.shape == (batch, output_dim)
    assert jnp.allclose(out, ref, atol=1e-5, rtol=1e-5), "f32 mismatch vs reference"

    # bf16 compute path (valid on v5e/v6e/v7x); f32 accumulate, looser tol.
    fwd_bf16 = make_mlp_forward(params, compute_dtype=jnp.bfloat16)
    out_bf16 = jax.block_until_ready(fwd_bf16(x))
    assert jnp.allclose(out_bf16, ref, atol=3e-2, rtol=3e-2), "bf16 mismatch vs reference"

    # Ragged-batch path (no wrapper-side batch padding; last block edge-masked).
    x2 = jax.random.normal(jax.random.PRNGKey(1), (19, input_dim), jnp.float32)
    out2 = jax.block_until_ready(fwd_f32(x2))
    assert out2.shape == (19, output_dim)
    assert jnp.allclose(out2, mlp_reference(params, x2), atol=1e-5, rtol=1e-5), \
        "ragged-batch mismatch vs reference"

    print("KERNEL_OK")
</pallas_src>

<mosaic_0001>
module attributes {stable_mosaic.version = 11 : i64} {
  func.func @_fused_mlp_kernel(%arg0: i32, %arg1: memref<8x4xf32, #tpu.memory_space<vmem>>, %arg2: memref<4x128xf32, #tpu.memory_space<vmem>>, %arg3: memref<1x128xf32, #tpu.memory_space<vmem>>, %arg4: memref<128x128xf32, #tpu.memory_space<vmem>>, %arg5: memref<1x128xf32, #tpu.memory_space<vmem>>, %arg6: memref<128x128xf32, #tpu.memory_space<vmem>>, %arg7: memref<1x128xf32, #tpu.memory_space<vmem>>, %arg8: memref<8x128xf32, #tpu.memory_space<vmem>>) attributes {dimension_semantics = [#tpu.dimension_semantics<parallel>], iteration_bounds = array<i64: 1>, scalar_prefetch = 0 : i64, scratch_operands = 0 : i64, tpu.core_type = #tpu.core_type<tc>, window_params = [{transform_indices = @transform_0, window_bounds = array<i64: 8, 4>}, {pipeline_mode = #tpu.pipeline_mode<synchronous>, transform_indices = @transform_1, window_bounds = array<i64: 4, 128>}, {pipeline_mode = #tpu.pipeline_mode<synchronous>, transform_indices = @transform_2, window_bounds = array<i64: 1, 128>}, {pipeline_mode = #tpu.pipeline_mode<synchronous>, transform_indices = @transform_3, window_bounds = array<i64: 128, 128>}, {pipeline_mode = #tpu.pipeline_mode<synchronous>, transform_indices = @transform_4, window_bounds = array<i64: 1, 128>}, {pipeline_mode = #tpu.pipeline_mode<synchronous>, transform_indices = @transform_5, window_bounds = array<i64: 128, 128>}, {pipeline_mode = #tpu.pipeline_mode<synchronous>, transform_indices = @transform_6, window_bounds = array<i64: 1, 128>}, {transform_indices = @transform_7, window_bounds = array<i64: 8, 128>}]} {
    %c0 = arith.constant 0 : index
    %c0_0 = arith.constant 0 : index
    %0 = vector.load %arg1[%c0, %c0_0] : memref<8x4xf32, #tpu.memory_space<vmem>>, vector<8x4xf32>
    %c0_1 = arith.constant 0 : index
    %c0_2 = arith.constant 0 : index
    %1 = vector.load %arg2[%c0_1, %c0_2] : memref<4x128xf32, #tpu.memory_space<vmem>>, vector<4x128xf32>
    %cst = arith.constant dense<0.000000e+00> : vector<8x128xf32>
    %2 = tpu.matmul %0, %1, %cst {dimension_numbers = #tpu.dot_dimension_numbers<[1], [0], [0], [1], [0, 0, 1, 1], [], []>, precision = #tpu.contract_precision<fp32>} : vector<8x4xf32>, vector<4x128xf32>, vector<8x128xf32> -> vector<8x128xf32>
    %c0_3 = arith.constant 0 : index
    %c0_4 = arith.constant 0 : index
    %3 = vector.load %arg3[%c0_3, %c0_4] : memref<1x128xf32, #tpu.memory_space<vmem>>, vector<1x128xf32>
    %4 = vector.broadcast %3 : vector<1x128xf32> to vector<8x128xf32>
    %5 = arith.addf %2, %4 : vector<8x128xf32>
    %6 = math.tanh %5 : vector<8x128xf32>
    %c0_5 = arith.constant 0 : index
    %c0_6 = arith.constant 0 : index
    %7 = vector.load %arg4[%c0_5, %c0_6] : memref<128x128xf32, #tpu.memory_space<vmem>>, vector<128x128xf32>
    %cst_7 = arith.constant dense<0.000000e+00> : vector<8x128xf32>
    %8 = tpu.matmul %6, %7, %cst_7 {dimension_numbers = #tpu.dot_dimension_numbers<[1], [0], [0], [1], [0, 0, 1, 1], [], []>, precision = #tpu.contract_precision<fp32>} : vector<8x128xf32>, vector<128x128xf32>, vector<8x128xf32> -> vector<8x128xf32>
    %c0_8 = arith.constant 0 : index
    %c0_9 = arith.constant 0 : index
    %9 = vector.load %arg5[%c0_8, %c0_9] : memref<1x128xf32, #tpu.memory_space<vmem>>, vector<1x128xf32>
    %10 = vector.broadcast %9 : vector<1x128xf32> to vector<8x128xf32>
    %11 = arith.addf %8, %10 : vector<8x128xf32>
    %12 = math.tanh %11 : vector<8x128xf32>
    %c0_10 = arith.constant 0 : index
    %c0_11 = arith.constant 0 : index
    %13 = vector.load %arg6[%c0_10, %c0_11] : memref<128x128xf32, #tpu.memory_space<vmem>>, vector<128x128xf32>
    %cst_12 = arith.constant dense<0.000000e+00> : vector<8x128xf32>
    %14 = tpu.matmul %12, %13, %cst_12 {dimension_numbers = #tpu.dot_dimension_numbers<[1], [0], [0], [1], [0, 0, 1, 1], [], []>, precision = #tpu.contract_precision<fp32>} : vector<8x128xf32>, vector<128x128xf32>, vector<8x128xf32> -> vector<8x128xf32>
    %c0_13 = arith.constant 0 : index
    %c0_14 = arith.constant 0 : index
    %15 = vector.load %arg7[%c0_13, %c0_14] : memref<1x128xf32, #tpu.memory_space<vmem>>, vector<1x128xf32>
    %16 = vector.broadcast %15 : vector<1x128xf32> to vector<8x128xf32>
    %17 = arith.addf %14, %16 : vector<8x128xf32>
    %c0_15 = arith.constant 0 : index
    %c0_16 = arith.constant 0 : index
    %18 = vector.load %arg8[%c0_15, %c0_16] : memref<8x128xf32, #tpu.memory_space<vmem>>, vector<8x128xf32>
    tpu.vector_store %arg8[%c0_15, %c0_16], %17 {strides = array<i32>} : memref<8x128xf32, #tpu.memory_space<vmem>>, vector<8x128xf32>,
    return
  }
  func.func @transform_0(%arg0: i32) -> (i32, i32) {
    %c0_i32 = arith.constant 0 : i32
    %c0_i32_0 = arith.constant 0 : i32
    return %arg0, %c0_i32 : i32, i32
  }
  func.func @transform_1(%arg0: i32) -> (i32, i32) {
    %c0_i32 = arith.constant 0 : i32
    %c0_i32_0 = arith.constant 0 : i32
    %c0_i32_1 = arith.constant 0 : i32
    return %c0_i32, %c0_i32_0 : i32, i32
  }
  func.func @transform_2(%arg0: i32) -> (i32, i32) {
    %c0_i32 = arith.constant 0 : i32
    %c0_i32_0 = arith.constant 0 : i32
    %c0_i32_1 = arith.constant 0 : i32
    return %c0_i32, %c0_i32_0 : i32, i32
  }
  func.func @transform_3(%arg0: i32) -> (i32, i32) {
    %c0_i32 = arith.constant 0 : i32
    %c0_i32_0 = arith.constant 0 : i32
    %c0_i32_1 = arith.constant 0 : i32
    return %c0_i32, %c0_i32_0 : i32, i32
  }
  func.func @transform_4(%arg0: i32) -> (i32, i32) {
    %c0_i32 = arith.constant 0 : i32
    %c0_i32_0 = arith.constant 0 : i32
    %c0_i32_1 = arith.constant 0 : i32
    return %c0_i32, %c0_i32_0 : i32, i32
  }
  func.func @transform_5(%arg0: i32) -> (i32, i32) {
    %c0_i32 = arith.constant 0 : i32
    %c0_i32_0 = arith.constant 0 : i32
    %c0_i32_1 = arith.constant 0 : i32
    return %c0_i32, %c0_i32_0 : i32, i32
  }
  func.func @transform_6(%arg0: i32) -> (i32, i32) {
    %c0_i32 = arith.constant 0 : i32
    %c0_i32_0 = arith.constant 0 : i32
    %c0_i32_1 = arith.constant 0 : i32
    return %c0_i32, %c0_i32_0 : i32, i32
  }
  func.func @transform_7(%arg0: i32) -> (i32, i32) {
    %c0_i32 = arith.constant 0 : i32
    %c0_i32_0 = arith.constant 0 : i32
    return %arg0, %c0_i32 : i32, i32
  }
}

</mosaic_0001>

<bundles_post_ra>
// kernel: forward.1
= control target key start
LH: loop header
LB: loop body
LE: loop exit
PB: predicated region body
PF: predicated region fallthrough
CT: control target
= control target key end

     0   :  { %12 = vsyncpa [#allocation3], 0  ;;  %s3502_s0 = inlined_call_operand.hbm [shape: f32[2,4], index: 0, kind: input, shape index: {}]   ;;  %s3503_s1 = inlined_call_operand.hbm [shape: f32[4,128], index: 1, kind: input, shape index: {}]   ;;  %s3504_s2 = inlined_call_operand.vmem [shape: f32[1,128], index: 2, kind: input, shape index: {}]   ;;  %s3505_s3 = inlined_call_operand.hbm [shape: f32[128,128], index: 3, kind: input, shape index: {}]   ;;  %s3506_s4 = inlined_call_operand.vmem [shape: f32[1,128], index: 4, kind: input, shape index: {}]   ;;  %s3507_s5 = inlined_call_operand.hbm [shape: f32[128,128], index: 5, kind: input, shape index: {}]   ;;  %s3508_s6 = inlined_call_operand.vmem [shape: f32[1,128], index: 6, kind: input, shape index: {}]   ;;  %s3509_s7 = inlined_call_operand.hbm [shape: f32[2,128], index: 7, kind: output, shape index: {}]  }
   0x1   :  { %13 = vsyncpa [#allocation6], 0 }
   0x2   :  { %14 = vsyncpa [#allocation9], 0 }
   0x3   :  { %15 = vsyncpa [#allocation4], 0 }
   0x4   :  { %20 = vsyncadd [#allocation3], 96  ;;  %s2685_s24 = smov [#allocation5]   ;;  %s2686_s26 = smov [#allocation2]  }
   0x5   :  { %s34_s25 = sshll.u32 %s2685_s24, 4  ;;  %s21_s27 = sshll.u32 %s2686_s26, 4  ;;  %s35_s25 = int_to_ptr.vmem [resolvable:$true] %s34_s25  ;;  %s22_s27 = int_to_ptr.vmem [resolvable:$true] %s21_s27 }
   0x6   :  { %s2585_s28 = scalar_lea.vmem %s35_s25, 64  ;;  %p2590_p1 = scmp.lt.s32.totalorder %s35_s25, %s35_s25 }
   0x7   :  { %p2586_p0 = scmp.ne.s32.totalorder %s35_s25, %s2585_s28  ;;  %p2591_p2 = scmp.lt.s32.totalorder %s2585_s28, %s2585_s28 }
   0x9   :  { %p2592_p3 = por %p2591_p2, %p2590_p1 }
   0xb   :  { %p2593_p4 = pnand %p2592_p3, %p2586_p0 }
   0xd   :  { %2596 = shalt.err (!%p2593_p4)
}
   0xe   :  { %37 = dma.hbm_to_vmem [thread:$0]  %s3503_s1, 64, %s35_s25, [#allocation6]  }
   0xf   :  { %s2605_s8 = scalar_lea.vmem %s22_s27, 32  ;;  %s2609_s9 = scalar_lea.vmem %s22_s27, 128 }
  0x10   :  { %p2606_p5 = scmp.ne.s32.totalorder %s22_s27, %s2605_s8  ;;  %p2610_p6 = scmp.lt.s32.totalorder %s22_s27, %s22_s27 }
  0x11   :  { %p2611_p7 = scmp.lt.s32.totalorder %s2609_s9, %s2605_s8 }
  0x13   :  { %p2612_p8 = por %p2611_p7, %p2610_p6 }
  0x15   :  { %p2613_p9 = pnand %p2612_p8, %p2606_p5 }
  0x17   :  { %2616 = shalt.err (!%p2613_p9)
}
  0x18   :  { %s2687_s10 = smov 32   ;;  %s2688_s11 = smov 2  }
  0x19   :  { %27 = dma.hbm_to_vmem [thread:$0]  %s3502_s0, 32, %s22_s27, [#allocation3], %s2687_s10, %s2687_s10, %s2688_s11  }
  0x1a   :  { %s2689_s14 = smov [#allocation7]  }
  0x1b   :  { %s45_s15 = sshll.u32 %s2689_s14, 4  ;;  %s46_s15 = int_to_ptr.vmem [resolvable:$true] %s45_s15 }
  0x1c   :  { %s2625_s1 = scalar_lea.vmem %s46_s15, 2048  ;;  %p2630_p11 = scmp.lt.s32.totalorder %s46_s15, %s46_s15 }
  0x1d   :  { %p2626_p10 = scmp.ne.s32.totalorder %s46_s15, %s2625_s1  ;;  %p2631_p12 = scmp.lt.s32.totalorder %s2625_s1, %s2625_s1 }
  0x1f   :  { %p2632_p13 = por %p2631_p12, %p2630_p11 }
  0x21   :  { %p2633_p0 = pnand %p2632_p13, %p2626_p10 }
  0x23   :  { %2636 = shalt.err (!%p2633_p0)
}
  0x24   :  { %s2690_s16 = smov 128   ;;  %s2691_s17 = smov 8  }
  0x25   :  { %51 = dma.hbm_to_vmem [thread:$0]  %s3505_s3, 2048, %s46_s15, [#allocation6], %s2690_s16, %s2690_s16, %s2691_s17  }
  0x26   :  { %s2692_s20 = smov [#allocation8]  }
  0x27   :  { %s59_s21 = sshll.u32 %s2692_s20, 4  ;;  %s60_s21 = int_to_ptr.vmem [resolvable:$true] %s59_s21 }
  0x28   :  { %s2645_s0 = scalar_lea.vmem %s60_s21, 2048  ;;  %p2650_p2 = scmp.lt.s32.totalorder %s60_s21, %s60_s21 }
  0x29   :  { %p2646_p1 = scmp.ne.s32.totalorder %s60_s21, %s2645_s0  ;;  %p2651_p3 = scmp.lt.s32.totalorder %s2645_s0, %s2645_s0 }
  0x2b   :  { %p2652_p4 = por %p2651_p3, %p2650_p2 }
  0x2d   :  { %p2653_p5 = pnand %p2652_p4, %p2646_p1 }
  0x2f   :  { %2656 = shalt.err (!%p2653_p5)
}
  0x30   :  { %65 = dma.hbm_to_vmem [thread:$0]  %s3507_s5, 2048, %s60_s21, [#allocation9], %s2690_s16, %s2690_s16, %s2691_s17  }
  0x31   :  { %2677 = dma.done.wait [#allocation3], 128  }
  0x32   :  { %2678 = vsyncadd [#allocation3], 4294967168 }
  0x33   :  { %2679 = dma.done.wait [#allocation6], 2112  }
  0x34   :  { %2680 = vsyncadd [#allocation6], 4294965184 }
  0x35   :  { %2681 = dma.done.wait [#allocation9], 2048  }
  0x36   :  { %2682 = vsyncadd [#allocation9], 4294965248  ;;  %v2693_v0 = vmov 0.0   ;;  %vm2694_vm0 = vmmov 0   ;;  %vm93_vm1 = vcmask 1043456   ;;  %vm89_vm2 = vcmask 31744  }
  0x37   :  { %2112 = vmatprep.subr.mxu0 %v2693_v0  ;;  %2114 = vmatprep.mubr.msk.f32.mxu0 %vm2694_vm0, %v2693_v0  ;;  %v81_v1 = vld [vmem:[#allocation5] sm:$0xf]  ;;  %v80_v2 = vld [vmem:[#allocation2] sm:$0xff]  ;;  %v557_v27 = vld [vmem:[#allocation7 + $0x68] sm:$0xff] }
  0x38   :  { %2117 = vmatprep.subr.mxu1 %v2693_v0  ;;  %2119 = vmatprep.mubr.msk.f32.mxu1 %vm2694_vm0, %v2693_v0  ;;  %v559_v3 = vld [vmem:[#allocation7 + $0x78] sm:$0xff]  ;;  %v95_v4 = vsel %vm93_vm1, %v81_v1, 0  ;;  %v91_v5 = vsel %vm89_vm2, %v80_v2, 0  ;;  %v558_v6 = vld [vmem:[#allocation7 + $0x70] sm:$0xff]  ;;  %v2799_v28 = vand.u32 4294901760, %v557_v27  ;;  %v556_v29 = vld [vmem:[#allocation7 + $0x60] sm:$0xff] }
  0x39   :  { %v128_v7 = vand.u32 4294901760, %v95_v4  ;;  %v163_v8 = vand.u32 4294901760, %v91_v5  ;;  %v2757_v9 = vand.u32 4294901760, %v559_v3  ;;  %v2759_v12 = vand.u32 4294901760, %v558_v6  ;;  %v555_v32 = vld [vmem:[#allocation7 + $0x58] sm:$0xff]  ;;  %v554_v36 = vld [vmem:[#allocation7 + $0x50] sm:$0xff] }
  0x3a   :  { %v2802_v30 = vsub.f32 %v557_v27, %v2799_v28  ;;  %v2804_v31 = vand.u32 4294901760, %v556_v29  ;;  %v2812_v35 = vand.u32 4294901760, %v555_v32  ;;  %v2823_v40 = vand.u32 4294901760, %v554_v36  ;;  %v553_v41 = vld [vmem:[#allocation7 + $0x48] sm:$0xff]  ;;  %v552_v47 = vld [vmem:[#allocation7 + $0x40] sm:$0xff]  ;;  %v551_v53 = vld [vmem:[#allocation7 + $0x38] sm:$0xff] }
  0x3b   :  { %2113 = vmatpush3.msra.mxu0 %v128_v7  ;;  %v164_v10 = vsub.f32 %v91_v5, %v163_v8  ;;  %v205_v11 = vsub.f32 %v95_v4, %v128_v7  ;;  %v2763_v15 = vsub.f32 %v559_v3, %v2757_v9  ;;  %v2766_v18 = vsub.f32 %v558_v6, %v2759_v12  ;;  %v550_v59 = vld [vmem:[#allocation7 + $0x30] sm:$0xff]  ;;  %v549_v2 = vld [vmem:[#allocation7 + $0x28] sm:$0xff] }
  0x3c   :  { %2122 = vmatprep.subr.mxu0 %v2693_v0  ;;  %v675_v33 = vand.u32 4294901760, %v2802_v30  ;;  %v2810_v34 = vsub.f32 %v556_v29, %v2804_v31  ;;  %v2821_v39 = vsub.f32 %v555_v32, %v2812_v35  ;;  %v2832_v45 = vsub.f32 %v554_v36, %v2823_v40 }
  0x3d   :  { %v165_v13 = vand.u32 4294901760, %v164_v10  ;;  %v206_v14 = vand.u32 4294901760, %v205_v11  ;;  %v661_v21 = vand.u32 4294901760, %v2763_v15  ;;  %v668_v22 = vand.u32 4294901760, %v2766_v18 }
  0x3e   :  { %v676_v37 = vsub.f32 %v2802_v30, %v675_v33  ;;  %v682_v38 = vand.u32 4294901760, %v2810_v34  ;;  %v689_v44 = vand.u32 4294901760, %v2821_v39  ;;  %v2835_v46 = vand.u32 4294901760, %v553_v41 }
  0x3f   :  { %v166_v16 = vsub.f32 %v164_v10, %v165_v13  ;;  %v207_v17 = vsub.f32 %v205_v11, %v206_v14  ;;  %v662_v23 = vsub.f32 %v2763_v15, %v661_v21  ;;  %v669_v24 = vsub.f32 %v2766_v18, %v668_v22 }
  0x40   :  { %v677_v42 = vand.u32 4294901760, %v676_v37  ;;  %v683_v43 = vsub.f32 %v2810_v34, %v682_v38  ;;  %v690_v49 = vsub.f32 %v2821_v39, %v689_v44  ;;  %v696_v50 = vand.u32 4294901760, %v2832_v45  ;;  %v545_v37 = vld [vmem:[#allocation7 + $0x8] sm:$0xff] }
  0x41   :  { %v167_v19 = vand.u32 4294901760, %v166_v16  ;;  %v208_v20 = vand.u32 4294901760, %v207_v17  ;;  %v663_v25 = vand.u32 4294901760, %v662_v23  ;;  %v670_v26 = vand.u32 4294901760, %v669_v24  ;;  %v547_v17 = vld [vmem:[#allocation7 + $0x18] sm:$0xff] }
  0x42   :  { %v684_v48 = vand.u32 4294901760, %v683_v43  ;;  %v2842_v51 = vand.u32 4294901760, %v552_v47  ;;  %v2846_v52 = vsub.f32 %v553_v41, %v2835_v46  ;;  %v691_v54 = vand.u32 4294901760, %v690_v49  ;;  %v544_v41 = vld [vmem:[#allocation7] sm:$0xff] }
  0x43   :  { %2115 = vmatmul.mubr.f32.vlgmr.msra.gmra.mxu0 %v167_v19  ;;  %2118 = vmatpush3.msra.mxu1 %v208_v20  ;;  %v697_v55 = vsub.f32 %v2832_v45, %v696_v50  ;;  %v2855_v57 = vand.u32 4294901760, %v551_v53  ;;  %v2865_v63 = vand.u32 4294901760, %v550_v59  ;;  %v2880_v6 = vand.u32 4294901760, %v549_v2 }
  0x44   :  { %2123 = vmatpush3.msra.mxu0 %v205_v11  ;;  %2120 = vmatmul.mubr.f32.vlgmr.msra.gmra.mxu1 %v163_v8  ;;  %v2853_v56 = vsub.f32 %v552_v47, %v2842_v51  ;;  %v703_v58 = vand.u32 4294901760, %v2846_v52  ;;  %v2901_v24 = vand.u32 4294901760, %v547_v17  ;;  %v2919_v43 = vand.u32 4294901760, %v545_v37 }
  0x45   :  { %2127 = vmatprep.subr.mxu1 %v2693_v0  ;;  %2124 = vmatprep.mubr.msk.f32.mxu0 %vm2694_vm0, %v2693_v0  ;;  %v698_v60 = vand.u32 4294901760, %v697_v55  ;;  %v2863_v62 = vsub.f32 %v551_v53, %v2855_v57  ;;  %v2878_v5 = vsub.f32 %v550_v59, %v2865_v63  ;;  %v2921_v47 = vand.u32 4294901760, %v544_v41 }
  0x46   :  { %2128 = vmatpush3.msra.mxu1 %v128_v7  ;;  %2132 = vmatprep.subr.mxu0 %v2693_v0  ;;  %v710_v61 = vand.u32 4294901760, %v2853_v56  ;;  %v704_v1 = vsub.f32 %v2846_v52, %v703_v58  ;;  %v2913_v32 = vsub.f32 %v547_v17, %v2901_v24  ;;  %v2934_v55 = vsub.f32 %v545_v37, %v2919_v43 }
  0x47   :  { %2125 = vmatmul.mubr.f32.vlgmr.msra.gmra.mxu0 %v164_v10  ;;  %2129 = vmatprep.mubr.msk.f32.mxu1 %vm2694_vm0, %v2693_v0  ;;  %v717_v4 = vand.u32 4294901760, %v2863_v62  ;;  %v2937_v59 = vsub.f32 %v544_v41, %v2921_v47 }
  0x48   :  { %2133 = vmatpush3.msra.mxu0 %v206_v14  ;;  %2130 = vmatmul.mubr.f32.vlgmr.msra.gmra.mxu1 %v165_v13  ;;  %v711_v3 = vsub.f32 %v2853_v56, %v710_v61  ;;  %v724_v13 = vand.u32 4294901760, %v2878_v5  ;;  %v2890_v14 = vsub.f32 %v549_v2, %v2880_v6  ;;  %v3513_v49 = vand.u32 4294901760, %v2913_v32 }
  0x49   :  { %2137 = vmatprep.subr.mxu1 %v2693_v0  ;;  %2134 = vmatprep.mubr.msk.f32.mxu0 %vm2694_vm0, %v2693_v0  ;;  %v718_v11 = vsub.f32 %v2863_v62, %v717_v4 }
  0x4a   :  { %2138 = vmatpush3.msra.mxu1 %v128_v7  ;;  %2139 = vmatprep.mubr.msk.f32.mxu1 %vm2694_vm0, %v2693_v0  ;;  %v705_v7 = vand.u32 4294901760, %v704_v1  ;;  %v712_v10 = vand.u32 4294901760, %v711_v3  ;;  %v725_v20 = vsub.f32 %v2878_v5, %v724_v13  ;;  %v3515_v23 = vand.u32 4294901760, %v2890_v14 }
  0x4b   :  { %2135 = vmatmul.mubr.f32.vlgmr.msra.gmra.mxu0 %v163_v8  ;;  %2177 = vmatprep.subr.mxu1 %v2693_v0  ;;  %v719_v19 = vand.u32 4294901760, %v718_v11  ;;  %v3511_v3 = vand.u32 4294901760, %v2934_v55 }
  0x4c   :  { %2140 = vmatmul.mubr.f32.vlgmr.msra.gmra.mxu1 %v163_v8  ;;  %2142 = vmatprep.subr.mxu0 %v2693_v0  ;;  %v548_v8 = vld [vmem:[#allocation7 + $0x20] sm:$0xff]  ;;  %v726_v27 = vand.u32 4294901760, %v725_v20  ;;  %v732_v29 = vsub.f32 %v2890_v14, %v3515_v23 }
  0x4d   :  { %2178 = vmatpush3.msra.mxu1 %v663_v25  ;;  %2143 = vmatpush3.msra.mxu0 %v2757_v9  ;;  %v2893_v16 = vand.u32 4294901760, %v548_v8  ;;  %v760_v11 = vsub.f32 %v2934_v55, %v3511_v3 }
  0x4e   :  { %2179 = vmatprep.subr.mxu1 %v2693_v0  ;;  %2144 = vmatprep.subr.mxu0 %v2693_v0 }
  0x4f   :  { %2180 = vmatpush3.msra.mxu1 %v670_v26  ;;  %2145 = vmatpush3.msra.mxu0 %v2759_v12  ;;  %v2905_v25 = vsub.f32 %v548_v8, %v2893_v16  ;;  %v546_v26 = vld [vmem:[#allocation7 + $0x10] sm:$0xff]  ;;  %v761_v20 = vand.u32 4294901760, %v760_v11 }
  0x50   :  { %2181 = vmatprep.subr.mxu1 %v2693_v0  ;;  %2146 = vmatprep.subr.mxu0 %v2693_v0  ;;  %v2915_v36 = vand.u32 4294901760, %v546_v26 }
  0x51   :  { %2209 = vmatprep.mubr.msk.f32.mxu1 %vm2694_vm0, %v2693_v0  ;;  %2174 = vmatprep.mubr.msk.f32.mxu0 %vm2694_vm0, %v2693_v0 }
  0x52   :  { %2147 = vmatpush3.msra.mxu0 %v2799_v28  ;;  %2182 = vmatpush3.msra.mxu1 %v677_v42  ;;  %v3514_v42 = vand.u32 4294901760, %v2905_v25  ;;  %v2927_v53 = vsub.f32 %v546_v26, %v2915_v36 }
  0x53   :  { %2148 = vmatprep.subr.mxu0 %v2693_v0  ;;  %2183 = vmatprep.subr.mxu1 %v2693_v0 }
  0x54   :  { %2149 = vmatpush3.msra.mxu0 %v2804_v31  ;;  %2184 = vmatpush3.msra.mxu1 %v684_v48  ;;  %v733_v48 = vand.u32 4294901760, %v732_v29  ;;  %v3512_v1 = vand.u32 4294901760, %v2927_v53 }
  0x55   :  { %2150 = vmatprep.subr.mxu0 %v2693_v0  ;;  %2185 = vmatprep.subr.mxu1 %v2693_v0 }
  0x56   :  { %2151 = vmatpush3.msra.mxu0 %v2812_v35  ;;  %2186 = vmatpush3.msra.mxu1 %v691_v54  ;;  %v739_v54 = vsub.f32 %v2905_v25, %v3514_v42 }
  0x57   :  { %2152 = vmatprep.subr.mxu0 %v2693_v0  ;;  %2187 = vmatprep.subr.mxu1 %v2693_v0 }
  0x58   :  { %2153 = vmatpush3.msra.mxu0 %v2823_v40  ;;  %2188 = vmatpush3.msra.mxu1 %v698_v60  ;;  %v746_v60 = vsub.f32 %v2913_v32, %v3513_v49  ;;  %v740_v2 = vand.u32 4294901760, %v739_v54 }
  0x59   :  { %2154 = vmatprep.subr.mxu0 %v2693_v0  ;;  %2189 = vmatprep.subr.mxu1 %v2693_v0 }
  0x5a   :  { %2155 = vmatpush3.msra.mxu0 %v2835_v46  ;;  %2190 = vmatpush3.msra.mxu1 %v705_v7  ;;  %v3510_v7 = vand.u32 4294901760, %v2937_v59  ;;  %v747_v8 = vand.u32 4294901760, %v746_v60 }
  0x5b   :  { %2156 = vmatprep.subr.mxu0 %v2693_v0  ;;  %2191 = vmatprep.subr.mxu1 %v2693_v0 }
  0x5c   :  { %2157 = vmatpush3.msra.mxu0 %v2842_v51  ;;  %2192 = vmatpush3.msra.mxu1 %v712_v10  ;;  %v753_v10 = vsub.f32 %v2927_v53, %v3512_v1  ;;  %v767_v17 = vsub.f32 %v2937_v59, %v3510_v7 }
  0x5d   :  { %2158 = vmatprep.subr.mxu0 %v2693_v0  ;;  %2193 = vmatprep.subr.mxu1 %v2693_v0 }
  0x5e   :  { %2159 = vmatpush3.msra.mxu0 %v2855_v57  ;;  %2194 = vmatpush3.msra.mxu1 %v719_v19  ;;  %v754_v19 = vand.u32 4294901760, %v753_v10  ;;  %v768_v26 = vand.u32 4294901760, %v767_v17 }
  0x5f   :  { %2160 = vmatprep.subr.mxu0 %v2693_v0  ;;  %2195 = vmatprep.subr.mxu1 %v2693_v0 }
  0x60   :  { %2161 = vmatpush3.msra.mxu0 %v2865_v63  ;;  %2196 = vmatpush3.msra.mxu1 %v726_v27  ;;  %v1893_v27 = vld [vmem:[%s3504_s2] ss:$0 sm:$0xff] }
  0x61   :  { %2162 = vmatprep.subr.mxu0 %v2693_v0  ;;  %2197 = vmatprep.subr.mxu1 %v2693_v0 }
  0x62   :  { %2163 = vmatpush3.msra.mxu0 %v2880_v6  ;;  %2198 = vmatpush3.msra.mxu1 %v733_v48 }
  0x63   :  { %2164 = vmatprep.subr.mxu0 %v2693_v0  ;;  %2199 = vmatprep.subr.mxu1 %v2693_v0 }
  0x64   :  { %2165 = vmatpush3.msra.mxu0 %v2893_v16  ;;  %2200 = vmatpush3.msra.mxu1 %v740_v2 }
  0x65   :  { %2166 = vmatprep.subr.mxu0 %v2693_v0  ;;  %2201 = vmatprep.subr.mxu1 %v2693_v0 }
  0x66   :  { %2167 = vmatpush3.msra.mxu0 %v2901_v24  ;;  %2202 = vmatpush3.msra.mxu1 %v747_v8 }
  0x67   :  { %2168 = vmatprep.subr.mxu0 %v2693_v0  ;;  %2203 = vmatprep.subr.mxu1 %v2693_v0 }
  0x68   :  { %2169 = vmatpush3.msra.mxu0 %v2915_v36  ;;  %2204 = vmatpush3.msra.mxu1 %v754_v19 }
  0x69   :  { %2170 = vmatprep.subr.mxu0 %v2693_v0  ;;  %2205 = vmatprep.subr.mxu1 %v2693_v0 }
  0x6a   :  { %2171 = vmatpush3.msra.mxu0 %v2919_v43  ;;  %2206 = vmatpush3.msra.mxu1 %v761_v20 }
  0x6b   :  { %2172 = vmatprep.subr.mxu0 %v2693_v0  ;;  %2207 = vmatprep.subr.mxu1 %v2693_v0 }
  0x6c   :  { %2173 = vmatpush3.msra.mxu0 %v2921_v47  ;;  %2208 = vmatpush3.msra.mxu1 %v768_v26 }
  0x6d   :  { %2212 = vmatprep.subr.mxu0 %v2693_v0  ;;  %2247 = vmatprep.subr.mxu1 %v2693_v0 }
 0x103   :  { %v169_v29 = vpop.f32.mrf.mxu0 }
 0x104   :  { %v170_v37 = vadd.f32 %v1893_v27, %v169_v29  ;;  %v245_v41 = vpop.f32.mrf.mxu1 }
 0x105   :  { %v2116_v48 = vpop.f32.mrf.mxu0 }
 0x106   :  { %v246_v54 = vadd.f32 %v245_v41, %v170_v37  ;;  %v2121_v60 = vpop.f32.mrf.mxu1 }
 0x107   :  { %v319_v2 = vpop.f32.mrf.mxu0  ;;  %v1215_v60 = vld [vmem:[#allocation8 + $0x30] sm:$0xff] }
 0x108   :  { %v320_v8 = vadd.f32 %v319_v2, %v246_v54  ;;  %v393_v10 = vpop.f32.mrf.mxu1 }
 0x109   :  { %v2126_v11 = vpop.f32.mrf.mxu0 }
 0x10a   :  { %v394_v17 = vadd.f32 %v393_v10, %v320_v8  ;;  %v2131_v19 = vpop.f32.mrf.mxu1  ;;  %v3227_v11 = vand.u32 4294901760, %v1215_v60 }
 0x10b   :  { %v467_v20 = vpop.f32.mrf.mxu0  ;;  %v1214_v19 = vld [vmem:[#allocation8 + $0x28] sm:$0xff] }
 0x10c   :  { %v468_v26 = vadd.f32 %v467_v20, %v394_v17  ;;  %v539_v7 = vpop.f32.mrf.mxu1 }
 0x10d   :  { %v2136_v3 = vpop.f32.mrf.mxu0 }
 0x10e   :  { %v540_v1 = vadd.f32 %v539_v7, %v468_v26  ;;  %v2141_v49 = vpop.f32.mrf.mxu1  ;;  %v1216_v7 = vld [vmem:[#allocation8 + $0x38] sm:$0xff] }
 0x10f   :  { %v3217_v48 = vand.u32 4294901760, %v1216_v7 }
 0x110   :  { %2573 = vtanh.f32 %v540_v1 }
 0x111   :  { %v3225_v10 = vsub.f32 %v1216_v7, %v3217_v48 }
 0x113   :  { %v1382_v26 = vand.u32 4294901760, %v3225_v10 }
 0x11d   :  { %v2574_v42 = vpop.eup %2573 }
 0x11e   :  { %v2970_v23 = vand.u32 4294901760, %v2574_v42 }
 0x120   :  { %2210 = vmatmul.mubr.f32.vlgmr.msra.gmra.mxu1 %v2970_v23  ;;  %v2974_v27 = vsub.f32 %v2574_v42, %v2970_v23 }
 0x121   :  { %2248 = vmatpush3.msra.mxu1 %v2757_v9  ;;  %2279 = vmatprep.mubr.msk.f32.mxu1 %vm2694_vm0, %v2693_v0 }
 0x122   :  { %2249 = vmatprep.subr.mxu1 %v2693_v0  ;;  %v650_v3 = vand.u32 4294901760, %v2974_v27 }
 0x123   :  { %2250 = vmatpush3.msra.mxu1 %v2759_v12 }
 0x124   :  { %2251 = vmatprep.subr.mxu1 %v2693_v0  ;;  %v651_v49 = vsub.f32 %v2974_v27, %v650_v3 }
 0x125   :  { %2252 = vmatpush3.msra.mxu1 %v2799_v28 }
 0x126   :  { %2253 = vmatprep.subr.mxu1 %v2693_v0  ;;  %v652_v42 = vand.u32 4294901760, %v651_v49 }
 0x127   :  { %2254 = vmatpush3.msra.mxu1 %v2804_v31 }
 0x128   :  { %2255 = vmatprep.subr.mxu1 %v2693_v0  ;;  %2175 = vmatmul.mubr.f32.vlgmr.msra.gmra.mxu0 %v652_v42  ;;  %v1213_v42 = vld [vmem:[#allocation8 + $0x20] sm:$0xff] }
 0x129   :  { %2213 = vmatpush3.msra.mxu0 %v2763_v15  ;;  %2256 = vmatpush3.msra.mxu1 %v2812_v35  ;;  %v3522_v15 = vand.u32 4294901760, %v2913_v32 }
 0x12a   :  { %2214 = vmatprep.subr.mxu0 %v2693_v0  ;;  %2257 = vmatprep.subr.mxu1 %v2693_v0 }
 0x12b   :  { %2215 = vmatpush3.msra.mxu0 %v2766_v18  ;;  %2258 = vmatpush3.msra.mxu1 %v2823_v40  ;;  %v3523_v18 = vand.u32 4294901760, %v2927_v53 }
 0x12c   :  { %2216 = vmatprep.subr.mxu0 %v2693_v0  ;;  %2259 = vmatprep.subr.mxu1 %v2693_v0 }
 0x12d   :  { %2217 = vmatpush3.msra.mxu0 %v2802_v30  ;;  %2260 = vmatpush3.msra.mxu1 %v2835_v46  ;;  %v1223_v30 = vld [vmem:[#allocation8 + $0x70] sm:$0xff] }
 0x12e   :  { %2218 = vmatprep.subr.mxu0 %v2693_v0  ;;  %2261 = vmatprep.subr.mxu1 %v2693_v0 }
 0x12f   :  { %2219 = vmatpush3.msra.mxu0 %v2810_v34  ;;  %2262 = vmatpush3.msra.mxu1 %v2842_v51 }
 0x130   :  { %2220 = vmatprep.subr.mxu0 %v2693_v0  ;;  %2263 = vmatprep.subr.mxu1 %v2693_v0 }
 0x131   :  { %2221 = vmatpush3.msra.mxu0 %v2821_v39  ;;  %2264 = vmatpush3.msra.mxu1 %v2855_v57 }
 0x132   :  { %2222 = vmatprep.subr.mxu0 %v2693_v0  ;;  %2265 = vmatprep.subr.mxu1 %v2693_v0 }
 0x133   :  { %2223 = vmatpush3.msra.mxu0 %v2832_v45  ;;  %2266 = vmatpush3.msra.mxu1 %v2865_v63 }
 0x134   :  { %2224 = vmatprep.subr.mxu0 %v2693_v0  ;;  %2267 = vmatprep.subr.mxu1 %v2693_v0 }
 0x135   :  { %2225 = vmatpush3.msra.mxu0 %v2846_v52  ;;  %2268 = vmatpush3.msra.mxu1 %v2880_v6  ;;  %v1221_v52 = vld [vmem:[#allocation8 + $0x60] sm:$0xff] }
 0x136   :  { %2226 = vmatprep.subr.mxu0 %v2693_v0  ;;  %2269 = vmatprep.subr.mxu1 %v2693_v0 }
 0x137   :  { %2227 = vmatpush3.msra.mxu0 %v2853_v56  ;;  %2270 = vmatpush3.msra.mxu1 %v2893_v16 }
 0x138   :  { %2228 = vmatprep.subr.mxu0 %v2693_v0  ;;  %2271 = vmatprep.subr.mxu1 %v2693_v0 }
 0x139   :  { %2229 = vmatpush3.msra.mxu0 %v2863_v62  ;;  %2272 = vmatpush3.msra.mxu1 %v2901_v24 }
 0x13a   :  { %2230 = vmatprep.subr.mxu0 %v2693_v0  ;;  %2273 = vmatprep.subr.mxu1 %v2693_v0 }
 0x13b   :  { %2231 = vmatpush3.msra.mxu0 %v2878_v5  ;;  %2274 = vmatpush3.msra.mxu1 %v2915_v36 }
 0x13c   :  { %2232 = vmatprep.subr.mxu0 %v2693_v0  ;;  %2275 = vmatprep.subr.mxu1 %v2693_v0 }
 0x13d   :  { %2233 = vmatpush3.msra.mxu0 %v2890_v14  ;;  %2276 = vmatpush3.msra.mxu1 %v2919_v43 }
 0x13e   :  { %2234 = vmatprep.subr.mxu0 %v2693_v0  ;;  %2277 = vmatprep.subr.mxu1 %v2693_v0 }
 0x13f   :  { %2235 = vmatpush3.msra.mxu0 %v2905_v25  ;;  %2278 = vmatpush3.msra.mxu1 %v2921_v47 }
 0x140   :  { %2236 = vmatprep.subr.mxu0 %v2693_v0  ;;  %2280 = vmatmul.mubr.f32.vlgmr.msra.gmra.mxu1 %v650_v3  ;;  %v3242_v3 = vand.u32 4294901760, %v1214_v19 }
 0x141   :  { %2317 = vmatprep.subr.mxu1 %v2693_v0  ;;  %2237 = vmatpush3.msra.mxu0 %v2913_v32 }
 0x142   :  { %2318 = vmatpush3.msra.mxu1 %v2757_v9  ;;  %2238 = vmatprep.subr.mxu0 %v2693_v0  ;;  %v3520_v9 = vand.u32 4294901760, %v2890_v14 }
 0x143   :  { %2319 = vmatprep.subr.mxu1 %v2693_v0  ;;  %2239 = vmatpush3.msra.mxu0 %v2927_v53 }
 0x144   :  { %2320 = vmatpush3.msra.mxu1 %v2759_v12  ;;  %2240 = vmatprep.subr.mxu0 %v2693_v0  ;;  %v3521_v12 = vand.u32 4294901760, %v2905_v25 }
 0x145   :  { %2321 = vmatprep.subr.mxu1 %v2693_v0  ;;  %2241 = vmatpush3.msra.mxu0 %v2934_v55 }
 0x146   :  { %2322 = vmatpush3.msra.mxu1 %v2799_v28  ;;  %2242 = vmatprep.subr.mxu0 %v2693_v0  ;;  %v1224_v28 = vld [vmem:[#allocation8 + $0x78] sm:$0xff] }
 0x147   :  { %2323 = vmatprep.subr.mxu1 %v2693_v0  ;;  %2243 = vmatpush3.msra.mxu0 %v2937_v59 }
 0x148   :  { %2244 = vmatprep.mubr.msk.f32.mxu0 %vm2694_vm0, %v2693_v0  ;;  %2324 = vmatpush3.msra.mxu1 %v2804_v31  ;;  %v3137_v31 = vand.u32 4294901760, %v1224_v28 }
 0x149   :  { %2245 = vmatmul.mubr.f32.vlgmr.msra.gmra.mxu0 %v2974_v27  ;;  %2282 = vmatprep.subr.mxu0 %v2693_v0  ;;  %v3240_v27 = vsub.f32 %v1215_v60, %v3227_v11 }
 0x14a   :  { %2325 = vmatprep.subr.mxu1 %v2693_v0  ;;  %2283 = vmatpush3.msra.mxu0 %v661_v21  ;;  %v3524_v21 = vand.u32 4294901760, %v2934_v55  ;;  %v3142_v34 = vsub.f32 %v1224_v28, %v3137_v31 }
 0x14b   :  { %2326 = vmatpush3.msra.mxu1 %v2812_v35  ;;  %2284 = vmatprep.subr.mxu0 %v2693_v0 }
 0x14c   :  { %2327 = vmatprep.subr.mxu1 %v2693_v0  ;;  %2285 = vmatpush3.msra.mxu0 %v668_v22  ;;  %v3525_v22 = vand.u32 4294901760, %v2937_v59 }
 0x14d   :  { %2328 = vmatpush3.msra.mxu1 %v2823_v40  ;;  %2286 = vmatprep.subr.mxu0 %v2693_v0 }
 0x14e   :  { %2329 = vmatprep.subr.mxu1 %v2693_v0  ;;  %2287 = vmatpush3.msra.mxu0 %v675_v33  ;;  %v3139_v33 = vand.u32 4294901760, %v1223_v30 }
 0x14f   :  { %2330 = vmatpush3.msra.mxu1 %v2835_v46  ;;  %2288 = vmatprep.subr.mxu0 %v2693_v0 }
 0x150   :  { %2331 = vmatprep.subr.mxu1 %v2693_v0  ;;  %2289 = vmatpush3.msra.mxu0 %v682_v38  ;;  %v3145_v35 = vsub.f32 %v1223_v30, %v3139_v33  ;;  %v1326_v38 = vand.u32 4294901760, %v3142_v34 }
 0x151   :  { %2332 = vmatpush3.msra.mxu1 %v2842_v51  ;;  %2290 = vmatprep.subr.mxu0 %v2693_v0 }
 0x152   :  { %2333 = vmatprep.subr.mxu1 %v2693_v0  ;;  %2291 = vmatpush3.msra.mxu0 %v689_v44  ;;  %v1333_v39 = vand.u32 4294901760, %v3145_v35  ;;  %v1327_v40 = vsub.f32 %v3142_v34, %v1326_v38 }
 0x153   :  { %2334 = vmatpush3.msra.mxu1 %v2855_v57  ;;  %2292 = vmatprep.subr.mxu0 %v2693_v0  ;;  %v3166_v57 = vand.u32 4294901760, %v1221_v52 }
 0x154   :  { %2335 = vmatprep.subr.mxu1 %v2693_v0  ;;  %2293 = vmatpush3.msra.mxu0 %v696_v50  ;;  %v1334_v44 = vsub.f32 %v3145_v35, %v1333_v39  ;;  %v1328_v45 = vand.u32 4294901760, %v1327_v40  ;;  %v1222_v50 = vld [vmem:[#allocation8 + $0x68] sm:$0xff] }
 0x155   :  { %2336 = vmatpush3.msra.mxu1 %v2865_v63  ;;  %2294 = vmatprep.subr.mxu0 %v2693_v0  ;;  %v3161_v51 = vand.u32 4294901760, %v1222_v50  ;;  %v3172_v62 = vsub.f32 %v1221_v52, %v3166_v57 }
 0x156   :  { %2337 = vmatprep.subr.mxu1 %v2693_v0  ;;  %2295 = vmatpush3.msra.mxu0 %v703_v58  ;;  %v1335_v46 = vand.u32 4294901760, %v1334_v44  ;;  %v1220_v58 = vld [vmem:[#allocation8 + $0x58] sm:$0xff] }
 0x157   :  { %2338 = vmatpush3.msra.mxu1 %v2880_v6  ;;  %2296 = vmatprep.subr.mxu0 %v2693_v0  ;;  %v3164_v56 = vsub.f32 %v1222_v50, %v3161_v51  ;;  %v3174_v63 = vand.u32 4294901760, %v1220_v58  ;;  %v1347_v6 = vand.u32 4294901760, %v3172_v62 }
 0x158   :  { %2339 = vmatprep.subr.mxu1 %v2693_v0  ;;  %2297 = vmatpush3.msra.mxu0 %v710_v61 }
 0x159   :  { %2340 = vmatpush3.msra.mxu1 %v2893_v16  ;;  %2298 = vmatprep.subr.mxu0 %v2693_v0  ;;  %v1340_v61 = vand.u32 4294901760, %v3164_v56  ;;  %v1218_v16 = vld [vmem:[#allocation8 + $0x48] sm:$0xff] }
 0x15a   :  { %2341 = vmatprep.subr.mxu1 %v2693_v0  ;;  %2299 = vmatpush3.msra.mxu0 %v717_v4  ;;  %v1219_v4 = vld [vmem:[#allocation8 + $0x50] sm:$0xff] }
 0x15b   :  { %2342 = vmatpush3.msra.mxu1 %v2901_v24  ;;  %2300 = vmatprep.subr.mxu0 %v2693_v0  ;;  %v1341_v5 = vsub.f32 %v3164_v56, %v1340_v61  ;;  %v3185_v14 = vand.u32 4294901760, %v1219_v4  ;;  %v1348_v24 = vsub.f32 %v3172_v62, %v1347_v6 }
 0x15c   :  { %2343 = vmatprep.subr.mxu1 %v2693_v0  ;;  %2301 = vmatpush3.msra.mxu0 %v724_v13  ;;  %v3183_v13 = vsub.f32 %v1220_v58, %v3174_v63 }
 0x15d   :  { %2344 = vmatpush3.msra.mxu1 %v2915_v36  ;;  %2302 = vmatprep.subr.mxu0 %v2693_v0  ;;  %v3194_v32 = vsub.f32 %v1219_v4, %v3185_v14  ;;  %v3197_v36 = vand.u32 4294901760, %v1218_v16 }
 0x15e   :  { %2345 = vmatprep.subr.mxu1 %v2693_v0  ;;  %2303 = vmatpush3.msra.mxu0 %v3520_v9  ;;  %v1354_v25 = vand.u32 4294901760, %v3183_v13 }
 0x15f   :  { %2346 = vmatpush3.msra.mxu1 %v2919_v43  ;;  %2304 = vmatprep.subr.mxu0 %v2693_v0  ;;  %v1217_v43 = vld [vmem:[#allocation8 + $0x40] sm:$0xff]  ;;  %v1361_v55 = vand.u32 4294901760, %v3194_v32  ;;  %v3208_v1 = vsub.f32 %v1218_v16, %v3197_v36 }
 0x160   :  { %2347 = vmatprep.subr.mxu1 %v2693_v0  ;;  %2305 = vmatpush3.msra.mxu0 %v3521_v12  ;;  %v1355_v53 = vsub.f32 %v3183_v13, %v1354_v25  ;;  %v3204_v59 = vand.u32 4294901760, %v1217_v43  ;;  %v1383_v12 = vsub.f32 %v3225_v10, %v1382_v26  ;;  %v1209_v16 = vld [vmem:[#allocation8] sm:$0xff] }
 0x161   :  { %2348 = vmatpush3.msra.mxu1 %v2921_v47  ;;  %2349 = vmatprep.mubr.msk.f32.mxu1 %vm2694_vm0, %v2693_v0  ;;  %v1349_v47 = vand.u32 4294901760, %v1348_v24  ;;  %v1362_v37 = vsub.f32 %v3194_v32, %v1361_v55  ;;  %v1368_v54 = vand.u32 4294901760, %v3208_v1 }
 0x162   :  { %2306 = vmatprep.subr.mxu0 %v2693_v0  ;;  %2350 = vmatmul.mubr.f32.vlgmr.msra.gmra.mxu1 %v2970_v23  ;;  %v1356_v29 = vand.u32 4294901760, %v1355_v53  ;;  %v3215_v41 = vsub.f32 %v1217_v43, %v3204_v59  ;;  %v1384_v28 = vand.u32 4294901760, %v1383_v12  ;;  %v3283_v43 = vand.u32 4294901760, %v1209_v16 }
 0x163   :  { %2307 = vmatpush3.msra.mxu0 %v3522_v15  ;;  %2314 = vmatprep.mubr.msk.f32.mxu0 %vm2694_vm0, %v2693_v0  ;;  %v1363_v2 = vand.u32 4294901760, %v1362_v37  ;;  %v1369_v17 = vsub.f32 %v3208_v1, %v1368_v54  ;;  %v1389_v15 = vand.u32 4294901760, %v3240_v27 }
 0x164   :  { %2308 = vmatprep.subr.mxu0 %v2693_v0  ;;  %2387 = vmatprep.subr.mxu1 %v2693_v0  ;;  %v1375_v8 = vand.u32 4294901760, %v3215_v41  ;;  %v3299_v60 = vsub.f32 %v1209_v16, %v3283_v43 }
 0x165   :  { %2309 = vmatpush3.msra.mxu0 %v3523_v18  ;;  %2419 = vmatprep.mubr.msk.f32.mxu1 %vm2694_vm0, %v2693_v0  ;;  %v1370_v49 = vand.u32 4294901760, %v1369_v17  ;;  %v3252_v18 = vsub.f32 %v1214_v19, %v3242_v3  ;;  %v1390_v30 = vsub.f32 %v3240_v27, %v1389_v15 }
 0x166   :  { %2310 = vmatprep.subr.mxu0 %v2693_v0  ;;  %2388 = vmatpush3.msra.mxu1 %v1328_v45  ;;  %v1376_v20 = vsub.f32 %v3215_v41, %v1375_v8 }
 0x167   :  { %2311 = vmatpush3.msra.mxu0 %v3524_v21  ;;  %2389 = vmatprep.subr.mxu1 %v2693_v0  ;;  %v3255_v21 = vand.u32 4294901760, %v1213_v42  ;;  %v1396_v40 = vand.u32 4294901760, %v3252_v18  ;;  %v1391_v50 = vand.u32 4294901760, %v1390_v30 }
 0x168   :  { %2312 = vmatprep.subr.mxu0 %v2693_v0  ;;  %2390 = vmatpush3.msra.mxu1 %v1335_v46  ;;  %v1377_v9 = vand.u32 4294901760, %v1376_v20  ;;  %v1211_v46 = vld [vmem:[#allocation8 + $0x10] sm:$0xff] }
 0x169   :  { %2313 = vmatpush3.msra.mxu0 %v3525_v22  ;;  %2391 = vmatprep.subr.mxu1 %v2693_v0  ;;  %v1212_v22 = vld [vmem:[#allocation8 + $0x18] sm:$0xff]  ;;  %v3267_v45 = vsub.f32 %v1213_v42, %v3255_v21  ;;  %v1397_v52 = vsub.f32 %v3252_v18, %v1396_v40  ;;  %v3277_v4 = vand.u32 4294901760, %v1211_v46 }
 0x16a   :  { %2315 = vmatmul.mubr.f32.vlgmr.msra.gmra.mxu0 %v2970_v23  ;;  %2352 = vmatprep.subr.mxu0 %v2693_v0  ;;  %v1342_v23 = vand.u32 4294901760, %v1341_v5  ;;  %v3263_v44 = vand.u32 4294901760, %v1212_v22  ;;  %v1210_v5 = vld [vmem:[#allocation8 + $0x8] sm:$0xff] }
 0x16b   :  { %2384 = vmatprep.mubr.msk.f32.mxu0 %vm2694_vm0, %v2693_v0  ;;  %2353 = vmatpush3.msra.mxu0 %v3137_v31  ;;  %v3281_v24 = vand.u32 4294901760, %v1210_v5  ;;  %v3289_v7 = vsub.f32 %v1211_v46, %v3277_v4 }
 0x16c   :  { %2354 = vmatprep.subr.mxu0 %v2693_v0  ;;  %2392 = vmatpush3.msra.mxu1 %v1342_v23  ;;  %v3275_v58 = vsub.f32 %v1212_v22, %v3263_v44  ;;  %v1403_v23 = vand.u32 4294901760, %v3267_v45 }
 0x16d   :  { %2355 = vmatpush3.msra.mxu0 %v3139_v33  ;;  %2393 = vmatprep.subr.mxu1 %v2693_v0  ;;  %v3296_v37 = vsub.f32 %v1210_v5, %v3281_v24  ;;  %v3518_v17 = vand.u32 4294901760, %v3289_v7 }
 0x16e   :  { %2356 = vmatprep.subr.mxu0 %v2693_v0  ;;  %2394 = vmatpush3.msra.mxu1 %v1349_v47  ;;  %v1398_v47 = vand.u32 4294901760, %v1397_v52  ;;  %v3519_v53 = vand.u32 4294901760, %v3275_v58 }
 0x16f   :  { %2357 = vmatpush3.msra.mxu0 %v3161_v51  ;;  %2395 = vmatprep.subr.mxu1 %v2693_v0  ;;  %v3517_v20 = vand.u32 4294901760, %v3296_v37 }
 0x170   :  { %2358 = vmatprep.subr.mxu0 %v2693_v0  ;;  %2396 = vmatpush3.msra.mxu1 %v1356_v29  ;;  %v1404_v29 = vsub.f32 %v3267_v45, %v1403_v23 }
 0x171   :  { %2359 = vmatpush3.msra.mxu0 %v3166_v57  ;;  %2397 = vmatprep.subr.mxu1 %v2693_v0  ;;  %v1425_v12 = vsub.f32 %v3296_v37, %v3517_v20 }
 0x172   :  { %2360 = vmatprep.subr.mxu0 %v2693_v0  ;;  %2398 = vmatpush3.msra.mxu1 %v1363_v2  ;;  %v1411_v2 = vsub.f32 %v3275_v58, %v3519_v53  ;;  %v1405_v19 = vand.u32 4294901760, %v1404_v29 }
 0x173   :  { %2361 = vmatpush3.msra.mxu0 %v3174_v63  ;;  %2399 = vmatprep.subr.mxu1 %v2693_v0  ;;  %v1426_v30 = vand.u32 4294901760, %v1425_v12 }
 0x174   :  { %2362 = vmatprep.subr.mxu0 %v2693_v0  ;;  %2400 = vmatpush3.msra.mxu1 %v1370_v49  ;;  %v3516_v49 = vand.u32 4294901760, %v3299_v60  ;;  %v1412_v42 = vand.u32 4294901760, %v1411_v2 }
 0x175   :  { %2363 = vmatpush3.msra.mxu0 %v3185_v14  ;;  %2401 = vmatprep.subr.mxu1 %v2693_v0 }
 0x176   :  { %2364 = vmatprep.subr.mxu0 %v2693_v0  ;;  %2402 = vmatpush3.msra.mxu1 %v1377_v9  ;;  %v1418_v9 = vsub.f32 %v3289_v7, %v3518_v17  ;;  %v1432_v22 = vsub.f32 %v3299_v60, %v3516_v49 }
 0x177   :  { %2365 = vmatpush3.msra.mxu0 %v3197_v36  ;;  %2403 = vmatprep.subr.mxu1 %v2693_v0 }
 0x178   :  { %2366 = vmatprep.subr.mxu0 %v2693_v0  ;;  %2404 = vmatpush3.msra.mxu1 %v1384_v28  ;;  %v1419_v28 = vand.u32 4294901760, %v1418_v9  ;;  %v1433_v46 = vand.u32 4294901760, %v1432_v22 }
 0x179   :  { %2367 = vmatpush3.msra.mxu0 %v3204_v59  ;;  %2405 = vmatprep.subr.mxu1 %v2693_v0 }
 0x17a   :  { %2368 = vmatprep.subr.mxu0 %v2693_v0  ;;  %2406 = vmatpush3.msra.mxu1 %v1391_v50 }
 0x17b   :  { %2369 = vmatpush3.msra.mxu0 %v3217_v48  ;;  %2407 = vmatprep.subr.mxu1 %v2693_v0 }
 0x17c   :  { %2370 = vmatprep.subr.mxu0 %v2693_v0  ;;  %2408 = vmatpush3.msra.mxu1 %v1398_v47 }
 0x17d   :  { %2371 = vmatpush3.msra.mxu0 %v3227_v11  ;;  %2409 = vmatprep.subr.mxu1 %v2693_v0 }
 0x17e   :  { %2372 = vmatprep.subr.mxu0 %v2693_v0  ;;  %2410 = vmatpush3.msra.mxu1 %v1405_v19 }
 0x17f   :  { %2373 = vmatpush3.msra.mxu0 %v3242_v3  ;;  %2411 = vmatprep.subr.mxu1 %v2693_v0 }
 0x180   :  { %2374 = vmatprep.subr.mxu0 %v2693_v0  ;;  %2412 = vmatpush3.msra.mxu1 %v1412_v42  ;;  %v1894_v42 = vld [vmem:[%s3506_s4] ss:$0 sm:$0xff] }
 0x181   :  { %2375 = vmatpush3.msra.mxu0 %v3255_v21  ;;  %2413 = vmatprep.subr.mxu1 %v2693_v0 }
 0x182   :  { %2376 = vmatprep.subr.mxu0 %v2693_v0  ;;  %2414 = vmatpush3.msra.mxu1 %v1419_v28 }
 0x183   :  { %2377 = vmatpush3.msra.mxu0 %v3263_v44  ;;  %2415 = vmatprep.subr.mxu1 %v2693_v0 }
 0x184   :  { %2378 = vmatprep.subr.mxu0 %v2693_v0  ;;  %2416 = vmatpush3.msra.mxu1 %v1426_v30 }
 0x185   :  { %2379 = vmatpush3.msra.mxu0 %v3277_v4  ;;  %2417 = vmatprep.subr.mxu1 %v2693_v0 }
 0x186   :  { %2380 = vmatprep.subr.mxu0 %v2693_v0  ;;  %2418 = vmatpush3.msra.mxu1 %v1433_v46 }
 0x187   :  { %2381 = vmatpush3.msra.mxu0 %v3281_v24  ;;  %2457 = vmatprep.subr.mxu1 %v2693_v0 }
 0x188   :  { %2382 = vmatprep.subr.mxu0 %v2693_v0 }
 0x189   :  { %2383 = vmatpush3.msra.mxu0 %v3283_v43 }
 0x18a   :  { %2422 = vmatprep.subr.mxu0 %v2693_v0 }
 0x1e0   :  { %v805_v50 = vpop.f32.mrf.mxu1 }
 0x1e2   :  { %v2211_v52 = vpop.f32.mrf.mxu1 }
 0x1e8   :  { %v654_v5 = vpop.f32.mrf.mxu0 }
 0x1e9   :  { %v655_v9 = vadd.f32 %v1894_v42, %v654_v5 }
 0x1ea   :  { %v2176_v16 = vpop.f32.mrf.mxu0 }
 0x1eb   :  { %v806_v22 = vadd.f32 %v805_v50, %v655_v9 }
 0x200   :  { %v998_v47 = vpop.f32.mrf.mxu1 }
 0x202   :  { %v2281_v29 = vpop.f32.mrf.mxu1 }
 0x209   :  { %v909_v2 = vpop.f32.mrf.mxu0 }
 0x20a   :  { %v910_v30 = vadd.f32 %v909_v2, %v806_v22 }
 0x20b   :  { %v2246_v19 = vpop.f32.mrf.mxu0 }
 0x20c   :  { %v999_v46 = vadd.f32 %v998_v47, %v910_v30 }
 0x222   :  { %v1204_v12 = vpop.f32.mrf.mxu1 }
 0x224   :  { %v2351_v28 = vpop.f32.mrf.mxu1 }
 0x22a   :  { %v1117_v49 = vpop.f32.mrf.mxu0 }
 0x22b   :  { %v1118_v20 = vadd.f32 %v1117_v49, %v999_v46 }
 0x22c   :  { %v2316_v17 = vpop.f32.mrf.mxu0 }
 0x22d   :  { %v1205_v52 = vadd.f32 %v1204_v12, %v1118_v20 }
 0x22f   :  { %2575 = vtanh.f32 %v1205_v52 }
 0x23c   :  { %v2576_v16 = vpop.eup %2575 }
 0x23d   :  { %v3332_v53 = vand.u32 4294901760, %v2576_v16 }
 0x23f   :  { %2420 = vmatmul.mubr.f32.vlgmr.msra.gmra.mxu1 %v3332_v53  ;;  %v3336_v29 = vsub.f32 %v2576_v16, %v3332_v53 }
 0x240   :  { %2458 = vmatpush3.msra.mxu1 %v3137_v31  ;;  %2489 = vmatprep.mubr.msk.f32.mxu1 %vm2694_vm0, %v2693_v0 }
 0x241   :  { %2459 = vmatprep.subr.mxu1 %v2693_v0  ;;  %v1315_v49 = vand.u32 4294901760, %v3336_v29 }
 0x242   :  { %2460 = vmatpush3.msra.mxu1 %v3139_v33 }
 0x243   :  { %2461 = vmatprep.subr.mxu1 %v2693_v0  ;;  %v1316_v17 = vsub.f32 %v3336_v29, %v1315_v49 }
 0x244   :  { %2462 = vmatpush3.msra.mxu1 %v3161_v51 }
 0x245   :  { %2463 = vmatprep.subr.mxu1 %v2693_v0  ;;  %v1317_v20 = vand.u32 4294901760, %v1316_v17 }
 0x246   :  { %2464 = vmatpush3.msra.mxu1 %v3166_v57 }
 0x247   :  { %2465 = vmatprep.subr.mxu1 %v2693_v0  ;;  %2385 = vmatmul.mubr.f32.vlgmr.msra.gmra.mxu0 %v1317_v20 }
 0x248   :  { %2423 = vmatpush3.msra.mxu0 %v3142_v34  ;;  %2466 = vmatpush3.msra.mxu1 %v3174_v63  ;;  %v3528_v34 = vand.u32 4294901760, %v3296_v37 }
 0x249   :  { %2424 = vmatprep.subr.mxu0 %v2693_v0  ;;  %2467 = vmatprep.subr.mxu1 %v2693_v0 }
 0x24a   :  { %2425 = vmatpush3.msra.mxu0 %v3145_v35  ;;  %2468 = vmatpush3.msra.mxu1 %v3185_v14  ;;  %v3529_v35 = vand.u32 4294901760, %v3299_v60 }
 0x24b   :  { %2426 = vmatprep.subr.mxu0 %v2693_v0  ;;  %2469 = vmatprep.subr.mxu1 %v2693_v0 }
 0x24c   :  { %2427 = vmatpush3.msra.mxu0 %v3164_v56  ;;  %2470 = vmatpush3.msra.mxu1 %v3197_v36 }
 0x24d   :  { %2428 = vmatprep.subr.mxu0 %v2693_v0  ;;  %2471 = vmatprep.subr.mxu1 %v2693_v0 }
 0x24e   :  { %2429 = vmatpush3.msra.mxu0 %v3172_v62  ;;  %2472 = vmatpush3.msra.mxu1 %v3204_v59 }
 0x24f   :  { %2430 = vmatprep.subr.mxu0 %v2693_v0  ;;  %2473 = vmatprep.subr.mxu1 %v2693_v0 }
 0x250   :  { %2431 = vmatpush3.msra.mxu0 %v3183_v13  ;;  %2474 = vmatpush3.msra.mxu1 %v3217_v48 }
 0x251   :  { %2432 = vmatprep.subr.mxu0 %v2693_v0  ;;  %2475 = vmatprep.subr.mxu1 %v2693_v0 }
 0x252   :  { %2433 = vmatpush3.msra.mxu0 %v3194_v32  ;;  %2476 = vmatpush3.msra.mxu1 %v3227_v11 }
 0x253   :  { %2434 = vmatprep.subr.mxu0 %v2693_v0  ;;  %2477 = vmatprep.subr.mxu1 %v2693_v0 }
 0x254   :  { %2435 = vmatpush3.msra.mxu0 %v3208_v1  ;;  %2478 = vmatpush3.msra.mxu1 %v3242_v3 }
 0x255   :  { %2436 = vmatprep.subr.mxu0 %v2693_v0  ;;  %2479 = vmatprep.subr.mxu1 %v2693_v0 }
 0x256   :  { %2437 = vmatpush3.msra.mxu0 %v3215_v41  ;;  %2480 = vmatpush3.msra.mxu1 %v3255_v21 }
 0x257   :  { %2438 = vmatprep.subr.mxu0 %v2693_v0  ;;  %2481 = vmatprep.subr.mxu1 %v2693_v0 }
 0x258   :  { %2439 = vmatpush3.msra.mxu0 %v3225_v10  ;;  %2482 = vmatpush3.msra.mxu1 %v3263_v44 }
 0x259   :  { %2440 = vmatprep.subr.mxu0 %v2693_v0  ;;  %2483 = vmatprep.subr.mxu1 %v2693_v0 }
 0x25a   :  { %2441 = vmatpush3.msra.mxu0 %v3240_v27  ;;  %2484 = vmatpush3.msra.mxu1 %v3277_v4 }
 0x25b   :  { %2442 = vmatprep.subr.mxu0 %v2693_v0  ;;  %2485 = vmatprep.subr.mxu1 %v2693_v0 }
 0x25c   :  { %2443 = vmatpush3.msra.mxu0 %v3252_v18  ;;  %2486 = vmatpush3.msra.mxu1 %v3281_v24 }
 0x25d   :  { %2444 = vmatprep.subr.mxu0 %v2693_v0  ;;  %2487 = vmatprep.subr.mxu1 %v2693_v0 }
 0x25e   :  { %2445 = vmatpush3.msra.mxu0 %v3267_v45  ;;  %2488 = vmatpush3.msra.mxu1 %v3283_v43 }
 0x25f   :  { %2446 = vmatprep.subr.mxu0 %v2693_v0  ;;  %2490 = vmatmul.mubr.f32.vlgmr.msra.gmra.mxu1 %v1315_v49 }
 0x260   :  { %2527 = vmatprep.subr.mxu1 %v2693_v0  ;;  %2447 = vmatpush3.msra.mxu0 %v3275_v58 }
 0x261   :  { %2528 = vmatpush3.msra.mxu1 %v3137_v31  ;;  %2448 = vmatprep.subr.mxu0 %v2693_v0  ;;  %v3526_v31 = vand.u32 4294901760, %v3275_v58 }
 0x262   :  { %2529 = vmatprep.subr.mxu1 %v2693_v0  ;;  %2449 = vmatpush3.msra.mxu0 %v3289_v7 }
 0x263   :  { %2530 = vmatpush3.msra.mxu1 %v3139_v33  ;;  %2450 = vmatprep.subr.mxu0 %v2693_v0  ;;  %v3527_v33 = vand.u32 4294901760, %v3289_v7 }
 0x264   :  { %2531 = vmatprep.subr.mxu1 %v2693_v0  ;;  %2451 = vmatpush3.msra.mxu0 %v3296_v37 }
 0x265   :  { %2532 = vmatpush3.msra.mxu1 %v3161_v51  ;;  %2452 = vmatprep.subr.mxu0 %v2693_v0 }
 0x266   :  { %2533 = vmatprep.subr.mxu1 %v2693_v0  ;;  %2453 = vmatpush3.msra.mxu0 %v3299_v60 }
 0x267   :  { %2454 = vmatprep.mubr.msk.f32.mxu0 %vm2694_vm0, %v2693_v0  ;;  %2534 = vmatpush3.msra.mxu1 %v3166_v57 }
 0x268   :  { %2455 = vmatmul.mubr.f32.vlgmr.msra.gmra.mxu0 %v3336_v29  ;;  %2492 = vmatprep.subr.mxu0 %v2693_v0 }
 0x269   :  { %2535 = vmatprep.subr.mxu1 %v2693_v0  ;;  %2493 = vmatpush3.msra.mxu0 %v1326_v38 }
 0x26a   :  { %2536 = vmatpush3.msra.mxu1 %v3174_v63  ;;  %2494 = vmatprep.subr.mxu0 %v2693_v0 }
 0x26b   :  { %2537 = vmatprep.subr.mxu1 %v2693_v0  ;;  %2495 = vmatpush3.msra.mxu0 %v1333_v39 }
 0x26c   :  { %2538 = vmatpush3.msra.mxu1 %v3185_v14  ;;  %2496 = vmatprep.subr.mxu0 %v2693_v0 }
 0x26d   :  { %2539 = vmatprep.subr.mxu1 %v2693_v0  ;;  %2497 = vmatpush3.msra.mxu0 %v1340_v61 }
 0x26e   :  { %2540 = vmatpush3.msra.mxu1 %v3197_v36  ;;  %2498 = vmatprep.subr.mxu0 %v2693_v0 }
 0x26f   :  { %2541 = vmatprep.subr.mxu1 %v2693_v0  ;;  %2499 = vmatpush3.msra.mxu0 %v1347_v6  ;;  %v1895_v6 = vld [vmem:[%s3508_s6] ss:$0 sm:$0xff] }
 0x270   :  { %2542 = vmatpush3.msra.mxu1 %v3204_v59  ;;  %2500 = vmatprep.subr.mxu0 %v2693_v0 }
 0x271   :  { %2543 = vmatprep.subr.mxu1 %v2693_v0  ;;  %2501 = vmatpush3.msra.mxu0 %v1354_v25 }
 0x272   :  { %2544 = vmatpush3.msra.mxu1 %v3217_v48  ;;  %2502 = vmatprep.subr.mxu0 %v2693_v0 }
 0x273   :  { %2545 = vmatprep.subr.mxu1 %v2693_v0  ;;  %2503 = vmatpush3.msra.mxu0 %v1361_v55 }
 0x274   :  { %2546 = vmatpush3.msra.mxu1 %v3227_v11  ;;  %2504 = vmatprep.subr.mxu0 %v2693_v0 }
 0x275   :  { %2547 = vmatprep.subr.mxu1 %v2693_v0  ;;  %2505 = vmatpush3.msra.mxu0 %v1368_v54 }
 0x276   :  { %2548 = vmatpush3.msra.mxu1 %v3242_v3  ;;  %2506 = vmatprep.subr.mxu0 %v2693_v0 }
 0x277   :  { %2549 = vmatprep.subr.mxu1 %v2693_v0  ;;  %2507 = vmatpush3.msra.mxu0 %v1375_v8 }
 0x278   :  { %2550 = vmatpush3.msra.mxu1 %v3255_v21  ;;  %2508 = vmatprep.subr.mxu0 %v2693_v0 }
 0x279   :  { %2551 = vmatprep.subr.mxu1 %v2693_v0  ;;  %2509 = vmatpush3.msra.mxu0 %v1382_v26 }
 0x27a   :  { %2552 = vmatpush3.msra.mxu1 %v3263_v44  ;;  %2510 = vmatprep.subr.mxu0 %v2693_v0 }
 0x27b   :  { %2553 = vmatprep.subr.mxu1 %v2693_v0  ;;  %2511 = vmatpush3.msra.mxu0 %v1389_v15 }
 0x27c   :  { %2554 = vmatpush3.msra.mxu1 %v3277_v4  ;;  %2512 = vmatprep.subr.mxu0 %v2693_v0 }
 0x27d   :  { %2555 = vmatprep.subr.mxu1 %v2693_v0  ;;  %2513 = vmatpush3.msra.mxu0 %v1396_v40 }
 0x27e   :  { %2556 = vmatpush3.msra.mxu1 %v3281_v24  ;;  %2514 = vmatprep.subr.mxu0 %v2693_v0 }
 0x27f   :  { %2557 = vmatprep.subr.mxu1 %v2693_v0  ;;  %2515 = vmatpush3.msra.mxu0 %v1403_v23 }
 0x280   :  { %2558 = vmatpush3.msra.mxu1 %v3283_v43  ;;  %2559 = vmatprep.mubr.msk.f32.mxu1 %vm2694_vm0, %v2693_v0 }
 0x281   :  { %2516 = vmatprep.subr.mxu0 %v2693_v0  ;;  %2560 = vmatmul.mubr.f32.vlgmr.msra.gmra.mxu1 %v3332_v53 }
 0x282   :  { %2517 = vmatpush3.msra.mxu0 %v3526_v31  ;;  %2524 = vmatprep.mubr.msk.f32.mxu0 %vm2694_vm0, %v2693_v0 }
 0x283   :  { %2518 = vmatprep.subr.mxu0 %v2693_v0 }
 0x284   :  { %2519 = vmatpush3.msra.mxu0 %v3527_v33 }
 0x285   :  { %2520 = vmatprep.subr.mxu0 %v2693_v0 }
 0x286   :  { %2521 = vmatpush3.msra.mxu0 %v3528_v34 }
 0x287   :  { %2522 = vmatprep.subr.mxu0 %v2693_v0 }
 0x288   :  { %2523 = vmatpush3.msra.mxu0 %v3529_v35 }
 0x289   :  { %2525 = vmatmul.mubr.f32.vlgmr.msra.gmra.mxu0 %v3332_v53 }
 0x2ff   :  { %v1470_v38 = vpop.f32.mrf.mxu1 }
 0x301   :  { %v2421_v39 = vpop.f32.mrf.mxu1 }
 0x307   :  { %v1319_v51 = vpop.f32.mrf.mxu0 }
 0x308   :  { %v1320_v13 = vadd.f32 %v1895_v6, %v1319_v51 }
 0x309   :  { %v2386_v56 = vpop.f32.mrf.mxu0 }
 0x30a   :  { %v1471_v0 = vadd.f32 %v1470_v38, %v1320_v13 }
 0x31f   :  { %v1663_v57 = vpop.f32.mrf.mxu1 }
 0x321   :  { %v2491_v61 = vpop.f32.mrf.mxu1 }
 0x328   :  { %v1574_v62 = vpop.f32.mrf.mxu0 }
 0x329   :  { %v1575_v32 = vadd.f32 %v1574_v62, %v1471_v0 }
 0x32a   :  { %v2456_v63 = vpop.f32.mrf.mxu0 }
 0x32b   :  { %v1664_v36 = vadd.f32 %v1663_v57, %v1575_v32 }
 0x341   :  { %v1869_v14 = vpop.f32.mrf.mxu1 }
 0x343   :  { %v2561_v25 = vpop.f32.mrf.mxu1 }
 0x349   :  { %v1782_v55 = vpop.f32.mrf.mxu0 }
 0x34a   :  { %v1783_v59 = vadd.f32 %v1782_v55, %v1664_v36 }
 0x34b   :  { %v2526_v1 = vpop.f32.mrf.mxu0 }
 0x34c   :  { %v1870_v41 = vadd.f32 %v1869_v14, %v1783_v59 }
 0x34e   :  { %1873 = vst [vmem:[#allocation10] sm:$0xff] %v1870_v41 }
 0x34f   :  { %1878 = vsyncadd [#allocation4], 96  ;;  %s2695_s26 = smov [#allocation10]  }
 0x350   :  { %s1879_s27 = sshll.u32 %s2695_s26, 4  ;;  %s1880_s27 = int_to_ptr.vmem [resolvable:$true] %s1879_s27 }
 0x351   :  { %s2657_s28 = scalar_lea.vmem %s1880_s27, 32  ;;  %s2661_s29 = scalar_lea.vmem %s1880_s27, 128 }
 0x352   :  { %p2658_p6 = scmp.ne.s32.totalorder %s1880_s27, %s2657_s28  ;;  %p2662_p7 = scmp.lt.s32.totalorder %s1880_s27, %s1880_s27 }
 0x353   :  { %p2663_p8 = scmp.lt.s32.totalorder %s2661_s29, %s2657_s28 }
 0x355   :  { %p2664_p9 = por %p2663_p8, %p2662_p7 }
 0x357   :  { %p2665_p10 = pnand %p2664_p9, %p2658_p6 }
 0x359   :  { %2668 = shalt.err (!%p2665_p10)
}
 0x35a   :  { %1885 = dma.vmem_to_hbm [thread:$0]  %s1880_s27, 32, %s3509_s7, [#allocation4], %s2687_s10, %s2687_s10, %s2688_s11  }
 0x35b   :  { %2683 = dma.done.wait [#allocation4], 128  }
 0x35c   :  { %2684 = vsyncadd [#allocation4], 4294967168 }
 0x35d   :  { %1889 = vsyncpa [#allocation3], 1 }
 0x35e   :  { %1890 = vsyncpa [#allocation6], 1 }
 0x35f   :  { %1891 = vsyncpa [#allocation9], 1 }
 0x360   :  { %1892 = vsyncpa [#allocation4], 1 }

</bundles_post_ra>
